<compile_context>
chip_gen: v6e
topology: v6e:2x2x1
jax: 0.10.0
libtpu: 0.0.40
codegen_flags: <defaults>
</compile_context>

<pallas_src>
import functools

import jax
import jax.numpy as jnp
from jax import lax
from jax.experimental import pallas as pl
from jax.experimental.pallas import tpu as pltpu


def _round_up(v, m):
    return ((v + m - 1) // m) * m


def _next_pow2(v):
    return 1 << (v - 1).bit_length()


# --------------------------------------------------------------------------- #
# Fused kernel:  conv3x3+BN+ReLU  ->  conv3x3+BN+ReLU   (one batch element)    #
# --------------------------------------------------------------------------- #
def _dcnn_kernel(xp_ref, w1_ref, b1_ref, w2_ref, b2_ref, o_ref,
                 mid_ref, col_ref, *, S, W, L, Lmat, P0, Cp_in, Cp_mid):
    # xp_ref  : (1, Cp_in, Lbuf_in)   zero-padded, row-flat input (row stride S)
    # w*_ref  : (C_o, 9*C_i)          tap-major flattened conv weights (BN folded)
    # b*_ref  : (C_o, 1)              folded biases
    # o_ref   : (1, Cp_out, Lmat)     lane-dense flat output (stripped by wrapper)
    # mid_ref : (Cp_mid, Lbuf_mid)    VMEM staging of the padded layer-1 activation
    # col_ref : (9*Cp_big, Lmat)      im2col scratch shared by both layers

    # In-kernel valid-column mask (no mask DMA): col-in-row < W and lane < H*S.
    lane = lax.broadcasted_iota(jnp.int32, (1, Lmat), 1)
    mask = jnp.logical_and((lane & (S - 1)) < W, lane < L).astype(jnp.float32)

    # ---- layer 1: im2col (9 lane-shifted copies on sublanes) + ONE MXU matmul
    for t in range(9):                                   # static 3x3 tap unroll
        sh = (t // 3) * S + (t % 3)                      # flat lane shift of tap
        col_ref[t * Cp_in:(t + 1) * Cp_in, :] = xp_ref[0, :, sh:sh + Lmat]
    acc1 = jnp.dot(w1_ref[...], col_ref[:9 * Cp_in, :],
                   preferred_element_type=jnp.float32)
    # ReLU + zero garbage columns so they become the horizontal halo for layer 2.
    y1 = jnp.maximum(acc1 + b1_ref[...], 0.0) * mask

    # ---- stage layer-1 output as a zero-haloed padded-flat image in VMEM -----
    mid_ref[...] = jnp.zeros_like(mid_ref)               # halos (interior overwritten)
    mid_ref[:, P0:P0 + Lmat] = y1                        # 128-aligned lane-dense store

    # ---- layer 2: same im2col + single matmul over the staged image ----------
    base = P0 - S - 1
    for t in range(9):
        sh = base + (t // 3) * S + (t % 3)
        col_ref[t * Cp_mid:(t + 1) * Cp_mid, :] = mid_ref[:, sh:sh + Lmat]
    acc2 = jnp.dot(w2_ref[...], col_ref[:9 * Cp_mid, :],
                   preferred_element_type=jnp.float32)
    o_ref[0] = jnp.maximum(acc2 + b2_ref[...], 0.0)      # aligned lane-dense store


# --------------------------------------------------------------------------- #
# Wrapper: fold BN, build lane-dense padded views, launch the kernel           #
# --------------------------------------------------------------------------- #
def dcnn_forward(x, p, eps=1e-5):
    N, C_in, H, W = x.shape
    C_mid = p["w1"].shape[0]          # == C_in for DCNN
    C_out = p["w2"].shape[0]

    S = _next_pow2(W + 2)             # power-of-two row stride -> cheap in-kernel mask
    L = H * S                         # flat per-image output lanes (incl. garbage cols)
    Lmat = _round_up(L, 128)          # matmul / output lane width (unmasked stores)
    P0 = _round_up(S + 1, 128)        # 128-aligned start of the mid interior
    Cp_in, Cp_mid, Cp_out = (_round_up(c, 8) for c in (C_in, C_mid, C_out))
    Cp_big = max(Cp_in, Cp_mid)

    Lbuf_in = _round_up(max((H + 2) * S, 2 * S + 2 + Lmat), 128)
    Lbuf_mid = _round_up(P0 + S + 1 + Lmat, 128)

    # ---- fold eval-mode BatchNorm into the conv weights / biases -------------
    s1 = p["g1"] / jnp.sqrt(p["v1"] + eps)
    w1 = p["w1"] * s1[:, None, None, None]
    b1 = (p["bc1"] - p["m1"]) * s1 + p["be1"]
    s2 = p["g2"] / jnp.sqrt(p["v2"] + eps)
    w2 = p["w2"] * s2[:, None, None, None]
    b2 = (p["bc2"] - p["m2"]) * s2 + p["be2"]

    # ---- tap-major flattened weights: (C_out_p, 9*C_in_p), col = tap*Cip + ci --
    def flat_taps(w, co, ci, cop, cip):
        wt = jnp.transpose(w, (0, 2, 3, 1))                         # (O, ky, kx, I)
        wt = jnp.pad(wt, ((0, cop - co), (0, 0), (0, 0), (0, cip - ci)))
        return wt.reshape(cop, 9 * cip)

    w1_t = flat_taps(w1, C_mid, C_in, Cp_mid, Cp_in)
    w2_t = flat_taps(w2, C_out, C_mid, Cp_out, Cp_mid)
    b1_v = jnp.pad(b1, (0, Cp_mid - C_mid)).reshape(Cp_mid, 1)
    b2_v = jnp.pad(b2, (0, Cp_out - C_out)).reshape(Cp_out, 1)

    # ---- lane-dense zero-padded row-flat input: (N, Cp_in, Lbuf_in) -----------
    xp = jnp.pad(x, ((0, 0), (0, Cp_in - C_in), (1, 1), (1, S - W - 1)))
    xp = xp.reshape(N, Cp_in, (H + 2) * S)
    xp = jnp.pad(xp, ((0, 0), (0, 0), (0, Lbuf_in - (H + 2) * S)))

    kernel = functools.partial(_dcnn_kernel, S=S, W=W, L=L, Lmat=Lmat, P0=P0,
                               Cp_in=Cp_in, Cp_mid=Cp_mid)

    out = pl.pallas_call(
        kernel,
        out_shape=jax.ShapeDtypeStruct((N, Cp_out, Lmat), jnp.float32),
        grid=(N,),
        in_specs=[
            pl.BlockSpec((1, Cp_in, Lbuf_in), lambda b: (b, 0, 0)),   # x (padded/flat)
            pl.BlockSpec((Cp_mid, 9 * Cp_in), lambda b: (0, 0)),      # conv1 taps
            pl.BlockSpec((Cp_mid, 1), lambda b: (0, 0)),              # bias1
            pl.BlockSpec((Cp_out, 9 * Cp_mid), lambda b: (0, 0)),     # conv2 taps
            pl.BlockSpec((Cp_out, 1), lambda b: (0, 0)),              # bias2
        ],
        out_specs=pl.BlockSpec((1, Cp_out, Lmat), lambda b: (b, 0, 0)),
        scratch_shapes=[pltpu.VMEM((Cp_mid, Lbuf_mid), jnp.float32),   # mid staging
                        pltpu.VMEM((9 * Cp_big, Lmat), jnp.float32)],  # im2col
        compiler_params=pltpu.CompilerParams(
            dimension_semantics=("parallel",)),   # batch steps independent (v7x 2 TC)
    )(xp, w1_t, b1_v, w2_t, b2_v)

    # drop padded channels / lanes, strip garbage columns -> NCHW
    return out[:, :C_out, :L].reshape(N, C_out, H, S)[:, :, :, :W]


# --------------------------------------------------------------------------- #
# Pure-JAX reference (mirrors PyTorch DCNN in eval mode)                       #
# --------------------------------------------------------------------------- #
def dcnn_reference(x, p, eps=1e-5):
    def conv_bn_relu(x, w, bc, g, be, m, v):
        y = lax.conv_general_dilated(x, w, (1, 1), ((1, 1), (1, 1)),
                                     dimension_numbers=("NCHW", "OIHW", "NCHW"))
        y = y + bc[None, :, None, None]
        y = (y - m[None, :, None, None]) \
            * (g / jnp.sqrt(v + eps))[None, :, None, None] \
            + be[None, :, None, None]
        return jnp.maximum(y, 0.0)

    y = conv_bn_relu(x, p["w1"], p["bc1"], p["g1"], p["be1"], p["m1"], p["v1"])
    y = conv_bn_relu(y, p["w2"], p["bc2"], p["g2"], p["be2"], p["m2"], p["v2"])
    return y


# --------------------------------------------------------------------------- #
def init_params(key, c_in, c_out):
    ks = jax.random.split(key, 12)
    n = lambda k, s, sc=0.3: sc * jax.random.normal(k, s, dtype=jnp.float32)
    u = lambda k, s: jax.random.uniform(k, s, jnp.float32, 0.5, 1.5)
    return {
        # conv1 (C_in -> C_in) + BN1
        "w1": n(ks[0], (c_in, c_in, 3, 3)),  "bc1": n(ks[1], (c_in,), 0.1),
        "g1": u(ks[2], (c_in,)),             "be1": n(ks[3], (c_in,), 0.1),
        "m1": n(ks[4], (c_in,), 0.1),        "v1": u(ks[5], (c_in,)),
        # conv2 (C_in -> C_out) + BN2
        "w2": n(ks[6], (c_out, c_in, 3, 3)), "bc2": n(ks[7], (c_out,), 0.1),
        "g2": u(ks[8], (c_out,)),            "be2": n(ks[9], (c_out,), 0.1),
        "m2": n(ks[10], (c_out,), 0.1),      "v2": u(ks[11], (c_out,)),
    }


if __name__ == "__main__":
    # TODO(synk): BatchNorm2d is evaluated in inference mode (running statistics
    # folded into the convolutions); training-mode batch statistics are not computed.
    N, C_IN, C_OUT, H, W = 2, 4, 8, 16, 16
    key = jax.random.PRNGKey(0)
    kx, kp = jax.random.split(key)
    x = jax.random.normal(kx, (N, C_IN, H, W), dtype=jnp.float32)
    params = init_params(kp, C_IN, C_OUT)

    out = jax.jit(dcnn_forward)(x, params)
    out = jax.block_until_ready(out)

    ref = dcnn_reference(x, params)
    assert out.shape == (N, C_OUT, H, W)
    max_err = float(jnp.max(jnp.abs(out - ref)))
    assert jnp.allclose(out, ref, atol=2e-4, rtol=2e-4), max_err
    print("KERNEL_OK")
</pallas_src>

<mosaic_0001>
module attributes {stable_mosaic.version = 11 : i64} {
  func.func @_dcnn_kernel(%arg0: i32, %arg1: memref<1x8x640xf32, #tpu.memory_space<vmem>>, %arg2: memref<8x72xf32, #tpu.memory_space<vmem>>, %arg3: memref<8x1xf32, #tpu.memory_space<vmem>>, %arg4: memref<8x72xf32, #tpu.memory_space<vmem>>, %arg5: memref<8x1xf32, #tpu.memory_space<vmem>>, %arg6: memref<1x8x512xf32, #tpu.memory_space<vmem>>, %arg7: memref<8x768xf32, #tpu.memory_space<vmem>>, %arg8: memref<72x512xf32, #tpu.memory_space<vmem>>) attributes {dimension_semantics = [#tpu.dimension_semantics<parallel>], iteration_bounds = array<i64: 2>, scalar_prefetch = 0 : i64, scratch_operands = 2 : i64, tpu.core_type = #tpu.core_type<tc>, window_params = [{transform_indices = @transform_0, window_bounds = array<i64: 1, 8, 640>}, {pipeline_mode = #tpu.pipeline_mode<synchronous>, transform_indices = @transform_1, window_bounds = array<i64: 8, 72>}, {pipeline_mode = #tpu.pipeline_mode<synchronous>, transform_indices = @transform_2, window_bounds = array<i64: 8, 1>}, {pipeline_mode = #tpu.pipeline_mode<synchronous>, transform_indices = @transform_3, window_bounds = array<i64: 8, 72>}, {pipeline_mode = #tpu.pipeline_mode<synchronous>, transform_indices = @transform_4, window_bounds = array<i64: 8, 1>}, {transform_indices = @transform_5, window_bounds = array<i64: 1, 8, 512>}]} {
    %0 = tpu.iota {dimensions = array<i32: 1>} : vector<1x512xi32>
    %c31_i32 = arith.constant 31 : i32
    %1 = vector.broadcast %c31_i32 : i32 to vector<1x512xi32>
    %2 = arith.andi %0, %1 : vector<1x512xi32>
    %c16_i32 = arith.constant 16 : i32
    %3 = vector.broadcast %c16_i32 : i32 to vector<1x512xi32>
    %4 = arith.cmpi slt, %2, %3 : vector<1x512xi32>
    %c512_i32 = arith.constant 512 : i32
    %5 = vector.broadcast %c512_i32 : i32 to vector<1x512xi32>
    %6 = arith.cmpi slt, %0, %5 : vector<1x512xi32>
    %7 = arith.andi %4, %6 : vector<1x512xi1>
    %8 = arith.extui %7 : vector<1x512xi1> to vector<1x512xi32>
    %9 = arith.sitofp %8 : vector<1x512xi32> to vector<1x512xf32>
    %c0 = arith.constant 0 : index
    %c0_0 = arith.constant 0 : index
    %c0_1 = arith.constant 0 : index
    %10 = vector.load %arg1[%c0, %c0_0, %c0_1] : memref<1x8x640xf32, #tpu.memory_space<vmem>>, vector<1x8x512xf32>
    %11 = vector.shape_cast %10 : vector<1x8x512xf32> to vector<8x512xf32>
    %c0_2 = arith.constant 0 : index
    %c0_3 = arith.constant 0 : index
    %12 = vector.load %arg8[%c0_2, %c0_3] : memref<72x512xf32, #tpu.memory_space<vmem>>, vector<8x512xf32>
    tpu.vector_store %arg8[%c0_2, %c0_3], %11 {strides = array<i32>} : memref<72x512xf32, #tpu.memory_space<vmem>>, vector<8x512xf32>,
    %c0_4 = arith.constant 0 : index
    %c0_5 = arith.constant 0 : index
    %c1 = arith.constant 1 : index
    %13 = vector.load %arg1[%c0_4, %c0_5, %c1] : memref<1x8x640xf32, #tpu.memory_space<vmem>>, vector<1x8x512xf32>
    %14 = vector.shape_cast %13 : vector<1x8x512xf32> to vector<8x512xf32>
    %c8 = arith.constant 8 : index
    %c0_6 = arith.constant 0 : index
    %15 = vector.load %arg8[%c8, %c0_6] : memref<72x512xf32, #tpu.memory_space<vmem>>, vector<8x512xf32>
    tpu.vector_store %arg8[%c8, %c0_6], %14 {strides = array<i32>} : memref<72x512xf32, #tpu.memory_space<vmem>>, vector<8x512xf32>,
    %c0_7 = arith.constant 0 : index
    %c0_8 = arith.constant 0 : index
    %c2 = arith.constant 2 : index
    %16 = vector.load %arg1[%c0_7, %c0_8, %c2] : memref<1x8x640xf32, #tpu.memory_space<vmem>>, vector<1x8x512xf32>
    %17 = vector.shape_cast %16 : vector<1x8x512xf32> to vector<8x512xf32>
    %c16 = arith.constant 16 : index
    %c0_9 = arith.constant 0 : index
    %18 = vector.load %arg8[%c16, %c0_9] : memref<72x512xf32, #tpu.memory_space<vmem>>, vector<8x512xf32>
    tpu.vector_store %arg8[%c16, %c0_9], %17 {strides = array<i32>} : memref<72x512xf32, #tpu.memory_space<vmem>>, vector<8x512xf32>,
    %c0_10 = arith.constant 0 : index
    %c0_11 = arith.constant 0 : index
    %c32 = arith.constant 32 : index
    %19 = vector.load %arg1[%c0_10, %c0_11, %c32] : memref<1x8x640xf32, #tpu.memory_space<vmem>>, vector<1x8x512xf32>
    %20 = vector.shape_cast %19 : vector<1x8x512xf32> to vector<8x512xf32>
    %c24 = arith.constant 24 : index
    %c0_12 = arith.constant 0 : index
    %21 = vector.load %arg8[%c24, %c0_12] : memref<72x512xf32, #tpu.memory_space<vmem>>, vector<8x512xf32>
    tpu.vector_store %arg8[%c24, %c0_12], %20 {strides = array<i32>} : memref<72x512xf32, #tpu.memory_space<vmem>>, vector<8x512xf32>,
    %c0_13 = arith.constant 0 : index
    %c0_14 = arith.constant 0 : index
    %c33 = arith.constant 33 : index
    %22 = vector.load %arg1[%c0_13, %c0_14, %c33] : memref<1x8x640xf32, #tpu.memory_space<vmem>>, vector<1x8x512xf32>
    %23 = vector.shape_cast %22 : vector<1x8x512xf32> to vector<8x512xf32>
    %c32_15 = arith.constant 32 : index
    %c0_16 = arith.constant 0 : index
    %24 = vector.load %arg8[%c32_15, %c0_16] : memref<72x512xf32, #tpu.memory_space<vmem>>, vector<8x512xf32>
    tpu.vector_store %arg8[%c32_15, %c0_16], %23 {strides = array<i32>} : memref<72x512xf32, #tpu.memory_space<vmem>>, vector<8x512xf32>,
    %c0_17 = arith.constant 0 : index
    %c0_18 = arith.constant 0 : index
    %c34 = arith.constant 34 : index
    %25 = vector.load %arg1[%c0_17, %c0_18, %c34] : memref<1x8x640xf32, #tpu.memory_space<vmem>>, vector<1x8x512xf32>
    %26 = vector.shape_cast %25 : vector<1x8x512xf32> to vector<8x512xf32>
    %c40 = arith.constant 40 : index
    %c0_19 = arith.constant 0 : index
    %27 = vector.load %arg8[%c40, %c0_19] : memref<72x512xf32, #tpu.memory_space<vmem>>, vector<8x512xf32>
    tpu.vector_store %arg8[%c40, %c0_19], %26 {strides = array<i32>} : memref<72x512xf32, #tpu.memory_space<vmem>>, vector<8x512xf32>,
    %c0_20 = arith.constant 0 : index
    %c0_21 = arith.constant 0 : index
    %c64 = arith.constant 64 : index
    %28 = vector.load %arg1[%c0_20, %c0_21, %c64] : memref<1x8x640xf32, #tpu.memory_space<vmem>>, vector<1x8x512xf32>
    %29 = vector.shape_cast %28 : vector<1x8x512xf32> to vector<8x512xf32>
    %c48 = arith.constant 48 : index
    %c0_22 = arith.constant 0 : index
    %30 = vector.load %arg8[%c48, %c0_22] : memref<72x512xf32, #tpu.memory_space<vmem>>, vector<8x512xf32>
    tpu.vector_store %arg8[%c48, %c0_22], %29 {strides = array<i32>} : memref<72x512xf32, #tpu.memory_space<vmem>>, vector<8x512xf32>,
    %c0_23 = arith.constant 0 : index
    %c0_24 = arith.constant 0 : index
    %c65 = arith.constant 65 : index
    %31 = vector.load %arg1[%c0_23, %c0_24, %c65] : memref<1x8x640xf32, #tpu.memory_space<vmem>>, vector<1x8x512xf32>
    %32 = vector.shape_cast %31 : vector<1x8x512xf32> to vector<8x512xf32>
    %c56 = arith.constant 56 : index
    %c0_25 = arith.constant 0 : index
    %33 = vector.load %arg8[%c56, %c0_25] : memref<72x512xf32, #tpu.memory_space<vmem>>, vector<8x512xf32>
    tpu.vector_store %arg8[%c56, %c0_25], %32 {strides = array<i32>} : memref<72x512xf32, #tpu.memory_space<vmem>>, vector<8x512xf32>,
    %c0_26 = arith.constant 0 : index
    %c0_27 = arith.constant 0 : index
    %c66 = arith.constant 66 : index
    %34 = vector.load %arg1[%c0_26, %c0_27, %c66] : memref<1x8x640xf32, #tpu.memory_space<vmem>>, vector<1x8x512xf32>
    %35 = vector.shape_cast %34 : vector<1x8x512xf32> to vector<8x512xf32>
    %c64_28 = arith.constant 64 : index
    %c0_29 = arith.constant 0 : index
    %36 = vector.load %arg8[%c64_28, %c0_29] : memref<72x512xf32, #tpu.memory_space<vmem>>, vector<8x512xf32>
    tpu.vector_store %arg8[%c64_28, %c0_29], %35 {strides = array<i32>} : memref<72x512xf32, #tpu.memory_space<vmem>>, vector<8x512xf32>,
    %c0_30 = arith.constant 0 : index
    %c0_31 = arith.constant 0 : index
    %37 = vector.load %arg2[%c0_30, %c0_31] : memref<8x72xf32, #tpu.memory_space<vmem>>, vector<8x72xf32>
    %c0_32 = arith.constant 0 : index
    %c0_33 = arith.constant 0 : index
    %38 = vector.load %arg8[%c0_32, %c0_33] : memref<72x512xf32, #tpu.memory_space<vmem>>, vector<72x512xf32>
    %cst = arith.constant dense<0.000000e+00> : vector<8x512xf32>
    %39 = tpu.matmul %37, %38, %cst {dimension_numbers = #tpu.dot_dimension_numbers<[1], [0], [0], [1], [0, 0, 1, 1], [], []>} : vector<8x72xf32>, vector<72x512xf32>, vector<8x512xf32> -> vector<8x512xf32>
    %c0_34 = arith.constant 0 : index
    %c0_35 = arith.constant 0 : index
    %40 = vector.load %arg3[%c0_34, %c0_35] : memref<8x1xf32, #tpu.memory_space<vmem>>, vector<8x1xf32>
    %41 = vector.broadcast %40 : vector<8x1xf32> to vector<8x512xf32>
    %42 = arith.addf %39, %41 : vector<8x512xf32>
    %cst_36 = arith.constant 0.000000e+00 : f32
    %43 = vector.broadcast %cst_36 : f32 to vector<8x512xf32>
    %44 = arith.maximumf %42, %43 : vector<8x512xf32>
    %45 = vector.broadcast %9 : vector<1x512xf32> to vector<8x512xf32>
    %46 = arith.mulf %44, %45 : vector<8x512xf32>
    %cst_37 = arith.constant 0.000000e+00 : f32
    %47 = vector.broadcast %cst_37 : f32 to vector<8x768xf32>
    %c0_38 = arith.constant 0 : index
    %c0_39 = arith.constant 0 : index
    %48 = vector.load %arg7[%c0_38, %c0_39] : memref<8x768xf32, #tpu.memory_space<vmem>>, vector<8x768xf32>
    tpu.vector_store %arg7[%c0_38, %c0_39], %47 {strides = array<i32>} : memref<8x768xf32, #tpu.memory_space<vmem>>, vector<8x768xf32>,
    %c0_40 = arith.constant 0 : index
    %c128 = arith.constant 128 : index
    %49 = vector.load %arg7[%c0_40, %c128] : memref<8x768xf32, #tpu.memory_space<vmem>>, vector<8x512xf32>
    tpu.vector_store %arg7[%c0_40, %c128], %46 {strides = array<i32>} : memref<8x768xf32, #tpu.memory_space<vmem>>, vector<8x512xf32>,
    %c0_41 = arith.constant 0 : index
    %c95 = arith.constant 95 : index
    %50 = vector.load %arg7[%c0_41, %c95] : memref<8x768xf32, #tpu.memory_space<vmem>>, vector<8x512xf32>
    %c0_42 = arith.constant 0 : index
    %c0_43 = arith.constant 0 : index
    %51 = vector.load %arg8[%c0_42, %c0_43] : memref<72x512xf32, #tpu.memory_space<vmem>>, vector<8x512xf32>
    tpu.vector_store %arg8[%c0_42, %c0_43], %50 {strides = array<i32>} : memref<72x512xf32, #tpu.memory_space<vmem>>, vector<8x512xf32>,
    %c0_44 = arith.constant 0 : index
    %c96 = arith.constant 96 : index
    %52 = vector.load %arg7[%c0_44, %c96] : memref<8x768xf32, #tpu.memory_space<vmem>>, vector<8x512xf32>
    %c8_45 = arith.constant 8 : index
    %c0_46 = arith.constant 0 : index
    %53 = vector.load %arg8[%c8_45, %c0_46] : memref<72x512xf32, #tpu.memory_space<vmem>>, vector<8x512xf32>
    tpu.vector_store %arg8[%c8_45, %c0_46], %52 {strides = array<i32>} : memref<72x512xf32, #tpu.memory_space<vmem>>, vector<8x512xf32>,
    %c0_47 = arith.constant 0 : index
    %c97 = arith.constant 97 : index
    %54 = vector.load %arg7[%c0_47, %c97] : memref<8x768xf32, #tpu.memory_space<vmem>>, vector<8x512xf32>
    %c16_48 = arith.constant 16 : index
    %c0_49 = arith.constant 0 : index
    %55 = vector.load %arg8[%c16_48, %c0_49] : memref<72x512xf32, #tpu.memory_space<vmem>>, vector<8x512xf32>
    tpu.vector_store %arg8[%c16_48, %c0_49], %54 {strides = array<i32>} : memref<72x512xf32, #tpu.memory_space<vmem>>, vector<8x512xf32>,
    %c0_50 = arith.constant 0 : index
    %c127 = arith.constant 127 : index
    %56 = vector.load %arg7[%c0_50, %c127] : memref<8x768xf32, #tpu.memory_space<vmem>>, vector<8x512xf32>
    %c24_51 = arith.constant 24 : index
    %c0_52 = arith.constant 0 : index
    %57 = vector.load %arg8[%c24_51, %c0_52] : memref<72x512xf32, #tpu.memory_space<vmem>>, vector<8x512xf32>
    tpu.vector_store %arg8[%c24_51, %c0_52], %56 {strides = array<i32>} : memref<72x512xf32, #tpu.memory_space<vmem>>, vector<8x512xf32>,
    %c0_53 = arith.constant 0 : index
    %c128_54 = arith.constant 128 : index
    %58 = vector.load %arg7[%c0_53, %c128_54] : memref<8x768xf32, #tpu.memory_space<vmem>>, vector<8x512xf32>
    %c32_55 = arith.constant 32 : index
    %c0_56 = arith.constant 0 : index
    %59 = vector.load %arg8[%c32_55, %c0_56] : memref<72x512xf32, #tpu.memory_space<vmem>>, vector<8x512xf32>
    tpu.vector_store %arg8[%c32_55, %c0_56], %58 {strides = array<i32>} : memref<72x512xf32, #tpu.memory_space<vmem>>, vector<8x512xf32>,
    %c0_57 = arith.constant 0 : index
    %c129 = arith.constant 129 : index
    %60 = vector.load %arg7[%c0_57, %c129] : memref<8x768xf32, #tpu.memory_space<vmem>>, vector<8x512xf32>
    %c40_58 = arith.constant 40 : index
    %c0_59 = arith.constant 0 : index
    %61 = vector.load %arg8[%c40_58, %c0_59] : memref<72x512xf32, #tpu.memory_space<vmem>>, vector<8x512xf32>
    tpu.vector_store %arg8[%c40_58, %c0_59], %60 {strides = array<i32>} : memref<72x512xf32, #tpu.memory_space<vmem>>, vector<8x512xf32>,
    %c0_60 = arith.constant 0 : index
    %c159 = arith.constant 159 : index
    %62 = vector.load %arg7[%c0_60, %c159] : memref<8x768xf32, #tpu.memory_space<vmem>>, vector<8x512xf32>
    %c48_61 = arith.constant 48 : index
    %c0_62 = arith.constant 0 : index
    %63 = vector.load %arg8[%c48_61, %c0_62] : memref<72x512xf32, #tpu.memory_space<vmem>>, vector<8x512xf32>
    tpu.vector_store %arg8[%c48_61, %c0_62], %62 {strides = array<i32>} : memref<72x512xf32, #tpu.memory_space<vmem>>, vector<8x512xf32>,
    %c0_63 = arith.constant 0 : index
    %c160 = arith.constant 160 : index
    %64 = vector.load %arg7[%c0_63, %c160] : memref<8x768xf32, #tpu.memory_space<vmem>>, vector<8x512xf32>
    %c56_64 = arith.constant 56 : index
    %c0_65 = arith.constant 0 : index
    %65 = vector.load %arg8[%c56_64, %c0_65] : memref<72x512xf32, #tpu.memory_space<vmem>>, vector<8x512xf32>
    tpu.vector_store %arg8[%c56_64, %c0_65], %64 {strides = array<i32>} : memref<72x512xf32, #tpu.memory_space<vmem>>, vector<8x512xf32>,
    %c0_66 = arith.constant 0 : index
    %c161 = arith.constant 161 : index
    %66 = vector.load %arg7[%c0_66, %c161] : memref<8x768xf32, #tpu.memory_space<vmem>>, vector<8x512xf32>
    %c64_67 = arith.constant 64 : index
    %c0_68 = arith.constant 0 : index
    %67 = vector.load %arg8[%c64_67, %c0_68] : memref<72x512xf32, #tpu.memory_space<vmem>>, vector<8x512xf32>
    tpu.vector_store %arg8[%c64_67, %c0_68], %66 {strides = array<i32>} : memref<72x512xf32, #tpu.memory_space<vmem>>, vector<8x512xf32>,
    %c0_69 = arith.constant 0 : index
    %c0_70 = arith.constant 0 : index
    %68 = vector.load %arg4[%c0_69, %c0_70] : memref<8x72xf32, #tpu.memory_space<vmem>>, vector<8x72xf32>
    %c0_71 = arith.constant 0 : index
    %c0_72 = arith.constant 0 : index
    %69 = vector.load %arg8[%c0_71, %c0_72] : memref<72x512xf32, #tpu.memory_space<vmem>>, vector<72x512xf32>
    %cst_73 = arith.constant dense<0.000000e+00> : vector<8x512xf32>
    %70 = tpu.matmul %68, %69, %cst_73 {dimension_numbers = #tpu.dot_dimension_numbers<[1], [0], [0], [1], [0, 0, 1, 1], [], []>} : vector<8x72xf32>, vector<72x512xf32>, vector<8x512xf32> -> vector<8x512xf32>
    %c0_74 = arith.constant 0 : index
    %c0_75 = arith.constant 0 : index
    %71 = vector.load %arg5[%c0_74, %c0_75] : memref<8x1xf32, #tpu.memory_space<vmem>>, vector<8x1xf32>
    %72 = vector.broadcast %71 : vector<8x1xf32> to vector<8x512xf32>
    %73 = arith.addf %70, %72 : vector<8x512xf32>
    %cst_76 = arith.constant 0.000000e+00 : f32
    %74 = vector.broadcast %cst_76 : f32 to vector<8x512xf32>
    %75 = arith.maximumf %73, %74 : vector<8x512xf32>
    %c0_77 = arith.constant 0 : index
    %c0_78 = arith.constant 0 : index
    %c0_79 = arith.constant 0 : index
    %76 = vector.load %arg6[%c0_77, %c0_78, %c0_79] : memref<1x8x512xf32, #tpu.memory_space<vmem>>, vector<1x8x512xf32>
    %77 = vector.shape_cast %76 : vector<1x8x512xf32> to vector<8x512xf32>
    %78 = vector.shape_cast %75 : vector<8x512xf32> to vector<1x8x512xf32>
    tpu.vector_store %arg6[%c0_77, %c0_78, %c0_79], %78 {strides = array<i32>} : memref<1x8x512xf32, #tpu.memory_space<vmem>>, vector<1x8x512xf32>,
    return
  }
  func.func @transform_0(%arg0: i32) -> (i32, i32, i32) {
    %c0_i32 = arith.constant 0 : i32
    %c0_i32_0 = arith.constant 0 : i32
    %c0_i32_1 = arith.constant 0 : i32
    return %arg0, %c0_i32, %c0_i32_0 : i32, i32, i32
  }
  func.func @transform_1(%arg0: i32) -> (i32, i32) {
    %c0_i32 = arith.constant 0 : i32
    %c0_i32_0 = arith.constant 0 : i32
    %c0_i32_1 = arith.constant 0 : i32
    return %c0_i32, %c0_i32_0 : i32, i32
  }
  func.func @transform_2(%arg0: i32) -> (i32, i32) {
    %c0_i32 = arith.constant 0 : i32
    %c0_i32_0 = arith.constant 0 : i32
    %c0_i32_1 = arith.constant 0 : i32
    return %c0_i32, %c0_i32_0 : i32, i32
  }
  func.func @transform_3(%arg0: i32) -> (i32, i32) {
    %c0_i32 = arith.constant 0 : i32
    %c0_i32_0 = arith.constant 0 : i32
    %c0_i32_1 = arith.constant 0 : i32
    return %c0_i32, %c0_i32_0 : i32, i32
  }
  func.func @transform_4(%arg0: i32) -> (i32, i32) {
    %c0_i32 = arith.constant 0 : i32
    %c0_i32_0 = arith.constant 0 : i32
    %c0_i32_1 = arith.constant 0 : i32
    return %c0_i32, %c0_i32_0 : i32, i32
  }
  func.func @transform_5(%arg0: i32) -> (i32, i32, i32) {
    %c0_i32 = arith.constant 0 : i32
    %c0_i32_0 = arith.constant 0 : i32
    %c0_i32_1 = arith.constant 0 : i32
    return %arg0, %c0_i32, %c0_i32_0 : i32, i32, i32
  }
}

</mosaic_0001>

<bundles_post_ra>
// kernel: dcnn_forward.1
= control target key start
LH: loop header
LB: loop body
LE: loop exit
PB: predicated region body
PF: predicated region fallthrough
CT: control target
= control target key end

     0   :  { %s1350_s18 = smov 0   ;;  %s1625_s0 = inlined_call_operand.vmem [shape: f32[2,8,640], index: 0, kind: input, shape index: {}]   ;;  %s1626_s1 = inlined_call_operand.vmem [shape: f32[8,72], index: 1, kind: input, shape index: {}]   ;;  %s1627_s2 = inlined_call_operand.vmem [shape: f32[8,1], index: 2, kind: input, shape index: {}]   ;;  %s1628_s3 = inlined_call_operand.vmem [shape: f32[8,72], index: 3, kind: input, shape index: {}]   ;;  %s1629_s4 = inlined_call_operand.vmem [shape: f32[8,1], index: 4, kind: input, shape index: {}]   ;;  %s1630_s5 = inlined_call_operand.vmem [shape: f32[2,8,512], index: 5, kind: output, shape index: {}]  }
   0x1 LB: > { %s1253_s19 = sadd.s32 4294967295, %s1303_s18   ;;  %p1257_p0 = scmp.ge.s32.totalorder %s1303_s18, 1  ;;  %s1303_s18 = sphi %s1350_s18, %s15_s18  }
   0x2   : > { %p187_p1 = scmp.lt.s32.totalorder %s1303_s18, 3 }
   0x4   : > { %p188_p2 = pnand %p1257_p0, %p187_p1 }
   0x5   : > { %p215_p3 = scmp.lt.s32.totalorder (!%p188_p2), %s1253_s19, 1  ;;  %s1305_s24 = smov (!%p188_p2), 62  }
   0x6   : > { %191 = sbr.rel (%p188_p2) target bundleno = 796 (0x31c), region = 40  ;;  %s1306_s25 = smov (!%p188_p2), 63  }
   0x7   : > { %s1307_s26 = smov (!%p188_p2), 64   ;;  %s1308_s27 = smov (!%p188_p2), 94  }
   0x8   : > { %s1309_s28 = smov (!%p188_p2), 95   ;;  %s1310_s29 = smov (!%p188_p2), 96  }
   0x9   : > { %s1311_s30 = smov (!%p188_p2), 126   ;;  %s1313_s6 = smov (!%p188_p2), 127  }
   0xa   : > { %s1315_s9 = smov (!%p188_p2), 97   ;;  %s1316_s10 = smov (!%p188_p2), 1  }
   0xb   : > { %s1632_s19 = smov (!%p215_p3, %s1253_s19), 1  ;;  %v1312_v5 = vmov 0.0   ;;  %v1314_v6 = vmov 0   ;;  %v563_v7 = vld [vmem:[%s1627_s2] sm:$0xff]  ;;  %vm513_vm0 = vcmask 506880   ;;  %vm480_vm1 = vcmask 515072  }
   0xc   : > { %s1272_s20 = smul.u32 40, %s1632_s19  ;;  %637 = vmatprep.mubr.f32.mxu0 %v1312_v5  ;;  %708 = vmatprep.mubr.f32.mxu1 %v1312_v5  ;;  %vm447_vm2 = vcmask 523264   ;;  %vm414_vm3 = vcmask 769024   ;;  %vm381_vm4 = vcmask 777216   ;;  %vm348_vm5 = vcmask 785408   ;;  %s1317_s13 = smov 32  }
   0xd   : > { %1296 = vset.pattern.permute.xlu0 %v1314_v6  ;;  %vm315_vm6 = vcmask 1031168   ;;  %vm282_vm7 = vcmask 1039360   ;;  %vm569_vm8 = vcmask 588800   ;;  %s1318_s14 = smov 31   ;;  %s1319_s15 = smov 33   ;;  %vm925_vm13 = vcmask 793600  }
   0xe   : > { %s219_s23 = scalar_lea.vmem %s1625_s0, %s1272_s20  ;;  %vm852_vm14 = vcmask 7168   ;;  %vm819_vm15 = vcmask 252928   ;;  %s1271_s22 = sshll.u32 %s1632_s19, 5 }
   0xf   : > { %v1364_v0 = vld [vmem:[%s219_s23 + $0x18] sm:$0xff]  ;;  %v1366_v1 = vld [vmem:[%s219_s23 + $0x8] sm:$0xff]  ;;  %v497_v2 = vld [vmem:[%s219_s23 + $0x20] sm:$0xff] }
  0x10   : > { %509 = vrot.lane.b32.xlu1 %v1364_v0, %s1305_s24  ;;  %505 = vrot.lane.b32.xlu0 %v1366_v1, %s1305_s24  ;;  %v1370_v3 = vld [vmem:[%s219_s23 + $0x10] sm:$0xff]  ;;  %v1373_v4 = vld [vmem:[%s219_s23] sm:$0xff] }
  0x14   : > { %511 = vrot.lane.b32.xlu1 %v497_v2, %s1305_s24  ;;  %507 = vrot.lane.b32.xlu0 %v1370_v3, %s1305_s24 }
  0x18   : > { %503 = vrot.lane.b32.xlu0 %v1373_v4, %s1305_s24  ;;  %472 = vrot.lane.b32.xlu1 %v1366_v1, %s1306_s25 }
  0x1c   : > { %474 = vrot.lane.b32.xlu0 %v1370_v3, %s1306_s25  ;;  %476 = vrot.lane.b32.xlu1 %v1364_v0, %s1306_s25 }
  0x20   : > { %478 = vrot.lane.b32.xlu0 %v497_v2, %s1306_s25  ;;  %470 = vrot.lane.b32.xlu1 %v1373_v4, %s1306_s25  ;;  %s224_s25 = scalar_lea.vmem %s1630_s5, %s1271_s22 }
  0x24   : > { %441 = vrot.lane.b32.xlu1 %v1370_v3, %s1307_s26  ;;  %439 = vrot.lane.b32.xlu0 %v1366_v1, %s1307_s26 }
  0x28   : > { %445 = vrot.lane.b32.xlu1 %v497_v2, %s1307_s26  ;;  %443 = vrot.lane.b32.xlu0 %v1364_v0, %s1307_s26 }
  0x2c   : > { %437 = vrot.lane.b32.xlu0 %v1373_v4, %s1307_s26  ;;  %406 = vrot.lane.b32.xlu1 %v1366_v1, %s1308_s27 }
  0x30   : > { %408 = vrot.lane.b32.xlu0 %v1370_v3, %s1308_s27  ;;  %410 = vrot.lane.b32.xlu1 %v1364_v0, %s1308_s27 }
  0x34   : > { %412 = vrot.lane.b32.xlu0 %v497_v2, %s1308_s27  ;;  %404 = vrot.lane.b32.xlu1 %v1373_v4, %s1308_s27 }
  0x38   : > { %375 = vrot.lane.b32.xlu1 %v1370_v3, %s1309_s28  ;;  %373 = vrot.lane.b32.xlu0 %v1366_v1, %s1309_s28 }
  0x3c   : > { %379 = vrot.lane.b32.xlu1 %v497_v2, %s1309_s28  ;;  %377 = vrot.lane.b32.xlu0 %v1364_v0, %s1309_s28 }
  0x40   : > { %371 = vrot.lane.b32.xlu0 %v1373_v4, %s1309_s28  ;;  %340 = vrot.lane.b32.xlu1 %v1366_v1, %s1310_s29 }
  0x44   : > { %342 = vrot.lane.b32.xlu0 %v1370_v3, %s1310_s29  ;;  %344 = vrot.lane.b32.xlu1 %v1364_v0, %s1310_s29 }
  0x48   : > { %346 = vrot.lane.b32.xlu0 %v497_v2, %s1310_s29  ;;  %338 = vrot.lane.b32.xlu1 %v1373_v4, %s1310_s29 }
  0x4c   : > { %309 = vrot.lane.b32.xlu1 %v1370_v3, %s1311_s30  ;;  %307 = vrot.lane.b32.xlu0 %v1366_v1, %s1311_s30 }
  0x50   : > { %313 = vrot.lane.b32.xlu1 %v497_v2, %s1311_s30  ;;  %311 = vrot.lane.b32.xlu0 %v1364_v0, %s1311_s30 }
  0x54   : > { %305 = vrot.lane.b32.xlu0 %v1373_v4, %s1311_s30  ;;  %274 = vrot.lane.b32.xlu1 %v1366_v1, %s1313_s6 }
  0x58   : > { %276 = vrot.lane.b32.xlu0 %v1370_v3, %s1313_s6  ;;  %278 = vrot.lane.b32.xlu1 %v1364_v0, %s1313_s6 }
  0x5c   : > { %280 = vrot.lane.b32.xlu0 %v497_v2, %s1313_s6  ;;  %272 = vrot.lane.b32.xlu1 %v1373_v4, %s1313_s6 }
  0x60   : > { %566 = vperm.xlu0 %1296, %v563_v7   ;;  %988 = vrot.lane.b32.xlu1 %v1312_v5, %s1309_s28 }
  0x64   : > { %956 = vrot.lane.b32.xlu0 %v1312_v5, %s1310_s29  ;;  %923 = vrot.lane.b32.xlu1 %v1312_v5, %s1315_s9 }
  0x68   : > { %891 = vrot.lane.b32.xlu0 %v1312_v5, %s1313_s6  ;;  %809 = vrot.lane.b32.xlu1 %v1312_v5, %s1318_s14 }
  0x6c   : > { %842 = vrot.lane.b32.xlu0 %v1312_v5, %s1316_s10 }
  0x70   : > { %776 = vrot.lane.b32.xlu0 %v1312_v5, %s1317_s13 }
  0x82   : > { %v510_v8 = vpop.permute.xlu1 %509  ;;  %v506_v9 = vpop.permute.xlu0 %505 }
  0x86   : > { %v512_v10 = vpop.permute.xlu1 %511  ;;  %v508_v11 = vpop.permute.xlu0 %507 }
  0x87   : > { %v515_v12 = vsel %vm513_vm0, %v506_v9, %v508_v11  ;;  %v517_v13 = vsel %vm513_vm0, %v510_v8, %v512_v10  ;;  %v516_v14 = vsel %vm513_vm0, %v508_v11, %v510_v8 }
  0x88   : > { %587 = vmatprep.subr.mxu0 %v515_v12  ;;  %658 = vmatprep.subr.mxu1 %v517_v13 }
  0x89   : > { %659 = vmatpush1.msra.mxu1 %v516_v14 }
  0x8a   : > { %v504_v15 = vpop.permute.xlu0 %503  ;;  %v473_v16 = vpop.permute.xlu1 %472 }
  0x8b   : > { %v514_v17 = vsel %vm513_vm0, %v504_v15, %v506_v9  ;;  %vm786_vm0 = vcmask 261120  }
  0x8c   : > { %588 = vmatpush1.msra.mxu0 %v514_v17 }
  0x8e   : > { %v475_v18 = vpop.permute.xlu0 %474  ;;  %v477_v19 = vpop.permute.xlu1 %476 }
  0x8f   : > { %v482_v20 = vsel %vm480_vm1, %v473_v16, %v475_v18  ;;  %v483_v25 = vsel %vm480_vm1, %v475_v18, %v477_v19 }
  0x90   : > { %589 = vmatprep.subr.mxu0 %v482_v20 }
  0x92   : > { %v479_v21 = vpop.permute.xlu0 %478  ;;  %v471_v22 = vpop.permute.xlu1 %470 }
  0x93   : > { %v481_v23 = vsel %vm480_vm1, %v471_v22, %v473_v16  ;;  %v484_v24 = vsel %vm480_vm1, %v477_v19, %v479_v21  ;;  %v526_v21 = vld [vmem:[%s1626_s1] sm:$0xff]  ;;  %vm753_vm1 = vcmask 269312  }
  0x94   : > { %590 = vmatpush1.msra.mxu0 %v481_v23  ;;  %660 = vmatprep.subr.mxu1 %v484_v24 }
  0x95   : > { %661 = vmatpush1.msra.mxu1 %v483_v25 }
  0x96   : > { %v442_v26 = vpop.permute.xlu1 %441  ;;  %v440_v27 = vpop.permute.xlu0 %439 }
  0x97   : > { %v449_v28 = vsel %vm447_vm2, %v440_v27, %v442_v26 }
  0x98   : > { %591 = vmatprep.subr.mxu0 %v449_v28 }
  0x9a   : > { %v446_v29 = vpop.permute.xlu1 %445  ;;  %v444_v30 = vpop.permute.xlu0 %443 }
  0x9b   : > { %v451_v31 = vsel %vm447_vm2, %v444_v30, %v446_v29  ;;  %v450_v32 = vsel %vm447_vm2, %v442_v26, %v444_v30 }
  0x9c   : > { %662 = vmatprep.subr.mxu1 %v451_v31 }
  0x9d   : > { %663 = vmatpush1.msra.mxu1 %v450_v32 }
  0x9e   : > { %v438_v33 = vpop.permute.xlu0 %437  ;;  %v407_v34 = vpop.permute.xlu1 %406 }
  0x9f   : > { %v448_v35 = vsel %vm447_vm2, %v438_v33, %v440_v27 }
  0xa0   : > { %592 = vmatpush1.msra.mxu0 %v448_v35 }
  0xa2   : > { %v409_v36 = vpop.permute.xlu0 %408  ;;  %v411_v37 = vpop.permute.xlu1 %410 }
  0xa3   : > { %v416_v38 = vsel %vm414_vm3, %v407_v34, %v409_v36  ;;  %v417_v43 = vsel %vm414_vm3, %v409_v36, %v411_v37 }
  0xa4   : > { %593 = vmatprep.subr.mxu0 %v416_v38 }
  0xa6   : > { %v413_v39 = vpop.permute.xlu0 %412  ;;  %v405_v40 = vpop.permute.xlu1 %404 }
  0xa7   : > { %v415_v41 = vsel %vm414_vm3, %v405_v40, %v407_v34  ;;  %v418_v42 = vsel %vm414_vm3, %v411_v37, %v413_v39 }
  0xa8   : > { %594 = vmatpush1.msra.mxu0 %v415_v41  ;;  %664 = vmatprep.subr.mxu1 %v418_v42 }
  0xa9   : > { %665 = vmatpush1.msra.mxu1 %v417_v43 }
  0xaa   : > { %v376_v44 = vpop.permute.xlu1 %375  ;;  %v374_v45 = vpop.permute.xlu0 %373 }
  0xab   : > { %v383_v46 = vsel %vm381_vm4, %v374_v45, %v376_v44 }
  0xac   : > { %595 = vmatprep.subr.mxu0 %v383_v46 }
  0xae   : > { %v380_v47 = vpop.permute.xlu1 %379  ;;  %v378_v48 = vpop.permute.xlu0 %377 }
  0xaf   : > { %v385_v49 = vsel %vm381_vm4, %v378_v48, %v380_v47  ;;  %v384_v50 = vsel %vm381_vm4, %v376_v44, %v378_v48  ;;  %v1039_v48 = vld [vmem:[%s1629_s4] sm:$0xff] }
  0xb0   : > { %666 = vmatprep.subr.mxu1 %v385_v49 }
  0xb1   : > { %667 = vmatpush1.msra.mxu1 %v384_v50 }
  0xb2   : > { %v372_v51 = vpop.permute.xlu0 %371  ;;  %v341_v52 = vpop.permute.xlu1 %340 }
  0xb3   : > { %v382_v53 = vsel %vm381_vm4, %v372_v51, %v374_v45 }
  0xb4   : > { %596 = vmatpush1.msra.mxu0 %v382_v53 }
  0xb6   : > { %v343_v54 = vpop.permute.xlu0 %342  ;;  %v345_v55 = vpop.permute.xlu1 %344 }
  0xb7   : > { %v350_v56 = vsel %vm348_vm5, %v341_v52, %v343_v54  ;;  %v351_v61 = vsel %vm348_vm5, %v343_v54, %v345_v55 }
  0xb8   : > { %597 = vmatprep.subr.mxu0 %v350_v56 }
  0xba   : > { %v347_v57 = vpop.permute.xlu0 %346  ;;  %v339_v58 = vpop.permute.xlu1 %338 }
  0xbb   : > { %v349_v59 = vsel %vm348_vm5, %v339_v58, %v341_v52  ;;  %v352_v60 = vsel %vm348_vm5, %v345_v55, %v347_v57 }
  0xbc   : > { %598 = vmatpush1.msra.mxu0 %v349_v59  ;;  %668 = vmatprep.subr.mxu1 %v352_v60 }
  0xbd   : > { %669 = vmatpush1.msra.mxu1 %v351_v61 }
  0xbe   : > { %v310_v62 = vpop.permute.xlu1 %309  ;;  %v308_v63 = vpop.permute.xlu0 %307 }
  0xbf   : > { %v317_v2 = vsel %vm315_vm6, %v308_v63, %v310_v62 }
  0xc0   : > { %599 = vmatprep.subr.mxu0 %v317_v2 }
  0xc2   : > { %v314_v6 = vpop.permute.xlu1 %313  ;;  %v312_v7 = vpop.permute.xlu0 %311 }
  0xc3   : > { %v319_v8 = vsel %vm315_vm6, %v312_v7, %v314_v6  ;;  %v318_v9 = vsel %vm315_vm6, %v310_v62, %v312_v7 }
  0xc4   : > { %670 = vmatprep.subr.mxu1 %v319_v8 }
  0xc5   : > { %671 = vmatpush1.msra.mxu1 %v318_v9 }
  0xc6   : > { %v306_v10 = vpop.permute.xlu0 %305  ;;  %v275_v11 = vpop.permute.xlu1 %274 }
  0xc7   : > { %v316_v12 = vsel %vm315_vm6, %v306_v10, %v308_v63 }
  0xc8   : > { %600 = vmatpush1.msra.mxu0 %v316_v12 }
  0xca   : > { %v277_v13 = vpop.permute.xlu0 %276  ;;  %v279_v14 = vpop.permute.xlu1 %278 }
  0xcb   : > { %v284_v15 = vsel %vm282_vm7, %v275_v11, %v277_v13  ;;  %v285_v20 = vsel %vm282_vm7, %v277_v13, %v279_v14 }
  0xcc   : > { %601 = vmatprep.subr.mxu0 %v284_v15 }
  0xce   : > { %v281_v16 = vpop.permute.xlu0 %280  ;;  %v273_v17 = vpop.permute.xlu1 %272 }
  0xcf   : > { %v283_v18 = vsel %vm282_vm7, %v273_v17, %v275_v11  ;;  %v286_v19 = vsel %vm282_vm7, %v279_v14, %v281_v16 }
  0xd0   : > { %602 = vmatpush1.msra.mxu0 %v283_v18  ;;  %672 = vmatprep.subr.mxu1 %v286_v19 }
  0xd1   : > { %603 = vmatprep.subr.mxu0 %v1366_v1  ;;  %673 = vmatpush1.msra.mxu1 %v285_v20  ;;  %v225_v1 = vlaneseq }
  0xd2   : > { %604 = vmatpush1.msra.mxu0 %v1373_v4  ;;  %674 = vmatprep.subr.mxu1 %v1364_v0  ;;  %v989_v51 = vpop.permute.xlu1 %988 }
  0xd3   : > { %1265 = vmatmul.mubr.msk.f32.vlgmr.msra.gmra.mxu0 %vm569_vm8, %v526_v21  ;;  %675 = vmatpush1.msra.mxu1 %v1370_v3  ;;  %v226_v0 = vand.u32 127, %v225_v1 }
  0xd4   : > { %1266 = vmatmul.mubr.msk.f32.vlgmr.msra.gmra.mxu1 %vm569_vm8, %v526_v21  ;;  %1112 = vmatprep.mubr.f32.mxu0 %v1312_v5 }
  0xd5   : > { %1183 = vmatprep.mubr.f32.mxu1 %v1312_v5  ;;  %v228_v4 = vadd.s32 256, %v226_v0  ;;  %v230_v22 = vand.u32 31, %v226_v0  ;;  %v229_v34 = vadd.s32 384, %v226_v0  ;;  %v227_v35 = vadd.s32 128, %v226_v0 }
  0xd6   : > { %v924_v53 = vpop.permute.xlu1 %923 }
  0xd7   : > { %v232_v23 = vand.u32 31, %v228_v4  ;;  %vm234_vm9 = vcmp.lt.s32.totalorder %v230_v22, 16  ;;  %v233_v38 = vand.u32 31, %v229_v34  ;;  %v231_v39 = vand.u32 31, %v227_v35 }
  0xd8   : > { %v1261_v27 = vsel %vm234_vm9, 1.0, %v1312_v5 }
  0xd9   : > { %vm236_vm10 = vcmp.lt.s32.totalorder %v232_v23, 16  ;;  %vm237_vm11 = vcmp.lt.s32.totalorder %v233_v38, 16  ;;  %vm235_vm12 = vcmp.lt.s32.totalorder %v231_v39, 16 }
  0xda   : > { %v1263_v30 = vsel %vm236_vm10, 1.0, %v1312_v5  ;;  %v1264_v44 = vsel %vm237_vm11, 1.0, %v1312_v5  ;;  %v1262_v45 = vsel %vm235_vm12, 1.0, %v1312_v5  ;;  %v1543_v55 = vpop.permute.xlu1 %809 }
  0xdb   : > { %v567_v3 = vpop.permute.xlu0 %566 }
  0xdf   : > { %v957_v49 = vpop.permute.xlu0 %956 }
  0xe3   : > { %v1537_v50 = vpop.permute.xlu0 %891 }
  0xe7   : > { %v1539_v52 = vpop.permute.xlu0 %842 }
  0xeb   : > { %v1541_v54 = vpop.permute.xlu0 %776 }
 0x193   : > { %v639_v24 = vpop.f32.mrf.mxu0 }
 0x194   : > { %v640_v25 = vadd.f32 %v639_v24, %v567_v3  ;;  %v710_v26 = vpop.f32.mrf.mxu1 }
 0x195   : > { %v711_v28 = vadd.f32 %v710_v26, %v567_v3  ;;  %v641_v37 = vpop.f32.mrf.mxu0 }
 0x196   : > { %v715_v29 = vmax.f32 %v640_v25, 0.0  ;;  %v712_v36 = vpop.f32.mrf.mxu1  ;;  %v642_v41 = vadd.f32 %v641_v37, %v567_v3 }
 0x197   : > { %v717_v31 = vmax.f32 %v711_v28, 0.0  ;;  %v713_v40 = vadd.f32 %v712_v36, %v567_v3 }
 0x198   : > { %v1463_v32 = vmul.f32 %v1261_v27, %v715_v29  ;;  %v716_v43 = vmax.f32 %v642_v41, 0.0 }
 0x199   : > { %v1465_v33 = vmul.f32 %v1263_v30, %v717_v31  ;;  %v718_v42 = vmax.f32 %v713_v40, 0.0 }
 0x19a   : > { %980 = vrot.lane.b32.xlu0 %v1463_v32, %s1309_s28  ;;  %v1501_v47 = vmul.f32 %v1262_v45, %v716_v43 }
 0x19b   : > { %984 = vrot.lane.b32.xlu1 %v1465_v33, %s1309_s28  ;;  %v1499_v46 = vmul.f32 %v1264_v44, %v718_v42 }
 0x19e   : > { %952 = vrot.lane.b32.xlu0 %v1465_v33, %s1310_s29 }
 0x19f   : > { %948 = vrot.lane.b32.xlu1 %v1463_v32, %s1310_s29 }
 0x1a2   : > { %915 = vrot.lane.b32.xlu0 %v1463_v32, %s1315_s9 }
 0x1a3   : > { %919 = vrot.lane.b32.xlu1 %v1465_v33, %s1315_s9 }
 0x1a6   : > { %887 = vrot.lane.b32.xlu0 %v1465_v33, %s1313_s6 }
 0x1a7   : > { %883 = vrot.lane.b32.xlu1 %v1463_v32, %s1313_s6 }
 0x1aa   : > { %844 = vrot.lane.b32.xlu0 %v1463_v32, %s1316_s10 }
 0x1ab   : > { %811 = vrot.lane.b32.xlu1 %v1463_v32, %s1318_s14 }
 0x1ae   : > { %848 = vrot.lane.b32.xlu0 %v1465_v33, %s1316_s10 }
 0x1af   : > { %815 = vrot.lane.b32.xlu1 %v1465_v33, %s1318_s14 }
 0x1b2   : > { %778 = vrot.lane.b32.xlu0 %v1463_v32, %s1317_s13 }
 0x1b3   : > { %745 = vrot.lane.b32.xlu1 %v1463_v32, %s1319_s15 }
 0x1b6   : > { %782 = vrot.lane.b32.xlu0 %v1465_v33, %s1317_s13 }
 0x1b7   : > { %749 = vrot.lane.b32.xlu1 %v1465_v33, %s1319_s15 }
 0x1ba   : > { %986 = vrot.lane.b32.xlu0 %v1499_v46, %s1309_s28 }
 0x1bb   : > { %982 = vrot.lane.b32.xlu1 %v1501_v47, %s1309_s28 }
 0x1be   : > { %917 = vrot.lane.b32.xlu0 %v1501_v47, %s1315_s9 }
 0x1bf   : > { %950 = vrot.lane.b32.xlu1 %v1501_v47, %s1310_s29 }
 0x1c2   : > { %921 = vrot.lane.b32.xlu0 %v1499_v46, %s1315_s9 }
 0x1c3   : > { %954 = vrot.lane.b32.xlu1 %v1499_v46, %s1310_s29 }
 0x1c6   : > { %813 = vrot.lane.b32.xlu0 %v1501_v47, %s1318_s14 }
 0x1c7   : > { %885 = vrot.lane.b32.xlu1 %v1501_v47, %s1313_s6 }
 0x1ca   : > { %817 = vrot.lane.b32.xlu0 %v1499_v46, %s1318_s14 }
 0x1cb   : > { %889 = vrot.lane.b32.xlu1 %v1499_v46, %s1313_s6 }
 0x1ce   : > { %747 = vrot.lane.b32.xlu0 %v1501_v47, %s1319_s15 }
 0x1cf   : > { %846 = vrot.lane.b32.xlu1 %v1501_v47, %s1316_s10 }
 0x1d2   : > { %751 = vrot.lane.b32.xlu0 %v1499_v46, %s1319_s15 }
 0x1d3   : > { %850 = vrot.lane.b32.xlu1 %v1499_v46, %s1316_s10 }
 0x1d6   : > { %1042 = vperm.xlu0 %1296, %v1039_v48  }
 0x1d7   : > { %780 = vrot.lane.b32.xlu1 %v1501_v47, %s1317_s13 }
 0x1db   : > { %784 = vrot.lane.b32.xlu1 %v1499_v46, %s1317_s13 }
 0x1df   : > { %743 = vrot.lane.b32.xlu1 %v1312_v5, %s1319_s15 }
 0x20c   : > { %v981_v56 = vpop.permute.xlu0 %980 }
 0x20d   : > { %v985_v57 = vpop.permute.xlu1 %984 }
 0x210   : > { %v953_v58 = vpop.permute.xlu0 %952 }
 0x211   : > { %v949_v59 = vpop.permute.xlu1 %948 }
 0x214   : > { %v916_v60 = vpop.permute.xlu0 %915 }
 0x215   : > { %v920_v61 = vpop.permute.xlu1 %919 }
 0x218   : > { %v888_v62 = vpop.permute.xlu0 %887 }
 0x219   : > { %v884_v63 = vpop.permute.xlu1 %883 }
 0x21c   : > { %v845_v5 = vpop.permute.xlu0 %844 }
 0x21d   : > { %v1545_v2 = vpop.permute.xlu1 %811  ;;  %v853_v38 = vsel %vm852_vm14, %v1539_v52, %v845_v5 }
 0x21e   : > { %v820_v39 = vsel %vm819_vm15, %v1543_v55, %v1545_v2 }
 0x220   : > { %v1547_v6 = vpop.permute.xlu0 %848 }
 0x221   : > { %v1549_v7 = vpop.permute.xlu1 %815 }
 0x224   : > { %v1551_v8 = vpop.permute.xlu0 %778 }
 0x225   : > { %v1553_v9 = vpop.permute.xlu1 %745 }
 0x228   : > { %v1555_v10 = vpop.permute.xlu0 %782 }
 0x229   : > { %v1557_v11 = vpop.permute.xlu1 %749 }
 0x22c   : > { %v987_v12 = vpop.permute.xlu0 %986 }
 0x22d   : > { %v992_v13 = vsel %vm381_vm4, %v985_v57, %v987_v12  ;;  %v983_v14 = vpop.permute.xlu1 %982  ;;  %v993_v15 = vsel %vm381_vm4, %v987_v12, %v989_v51 }
 0x22e   : > { %v990_v16 = vsel %vm381_vm4, %v981_v56, %v983_v14  ;;  %1133 = vmatprep.subr.mxu1 %v993_v15  ;;  %v991_v17 = vsel %vm381_vm4, %v983_v14, %v985_v57 }
 0x22f   : > { %1062 = vmatprep.subr.mxu0 %v991_v17  ;;  %1134 = vmatpush1.msra.mxu1 %v992_v13 }
 0x230   : > { %1063 = vmatpush1.msra.mxu0 %v990_v16  ;;  %v918_v18 = vpop.permute.xlu0 %917 }
 0x231   : > { %v951_v19 = vpop.permute.xlu1 %950  ;;  %v927_v1 = vsel %vm925_vm13, %v918_v18, %v920_v61  ;;  %v926_v0 = vsel %vm925_vm13, %v916_v60, %v918_v18 }
 0x232   : > { %v958_v20 = vsel %vm348_vm5, %v949_v59, %v951_v19  ;;  %v959_v21 = vsel %vm348_vm5, %v951_v19, %v953_v58 }
 0x233   : > { %1064 = vmatprep.subr.mxu0 %v959_v21 }
 0x234   : > { %1065 = vmatpush1.msra.mxu0 %v958_v20  ;;  %v922_v4 = vpop.permute.xlu0 %921 }
 0x235   : > { %v955_v22 = vpop.permute.xlu1 %954  ;;  %1066 = vmatprep.subr.mxu0 %v927_v1  ;;  %v929_v24 = vsel %vm925_vm13, %v922_v4, %v924_v53  ;;  %v928_v25 = vsel %vm925_vm13, %v920_v61, %v922_v4 }
 0x236   : > { %v960_v23 = vsel %vm348_vm5, %v953_v58, %v955_v22  ;;  %1067 = vmatpush1.msra.mxu0 %v926_v0  ;;  %v961_v3 = vsel %vm348_vm5, %v955_v22, %v957_v49 }
 0x237   : > { %1135 = vmatprep.subr.mxu1 %v961_v3 }
 0x238   : > { %1136 = vmatpush1.msra.mxu1 %v960_v23  ;;  %v814_v29 = vpop.permute.xlu0 %813 }
 0x239   : > { %v886_v26 = vpop.permute.xlu1 %885  ;;  %1137 = vmatprep.subr.mxu1 %v929_v24  ;;  %v822_v44 = vsel %vm819_vm15, %v814_v29, %v1549_v7 }
 0x23a   : > { %v893_v27 = vsel %vm282_vm7, %v884_v63, %v886_v26  ;;  %1138 = vmatpush1.msra.mxu1 %v928_v25  ;;  %v894_v28 = vsel %vm282_vm7, %v886_v26, %v888_v62 }
 0x23b   : > { %1068 = vmatprep.subr.mxu0 %v894_v28 }
 0x23c   : > { %1069 = vmatpush1.msra.mxu0 %v893_v27  ;;  %v818_v35 = vpop.permute.xlu0 %817 }
 0x23d   : > { %v890_v30 = vpop.permute.xlu1 %889  ;;  %1070 = vmatprep.subr.mxu0 %v1501_v47  ;;  %v823_v43 = vsel %vm819_vm15, %v1549_v7, %v818_v35  ;;  %v787_v47 = vsel %vm786_vm0, %v1541_v54, %v1551_v8  ;;  %v1002_v54 = vld [vmem:[%s1628_s3] sm:$0xff] }
 0x23e   : > { %v895_v31 = vsel %vm282_vm7, %v888_v62, %v890_v30  ;;  %1071 = vmatpush1.msra.mxu0 %v1463_v32  ;;  %v896_v34 = vsel %vm282_vm7, %v890_v30, %v1537_v50  ;;  %v821_v32 = vsel %vm819_vm15, %v1545_v2, %v814_v29 }
 0x23f   : > { %1139 = vmatprep.subr.mxu1 %v896_v34 }
 0x240   : > { %1140 = vmatpush1.msra.mxu1 %v895_v31  ;;  %v748_v41 = vpop.permute.xlu0 %747 }
 0x241   : > { %v847_v36 = vpop.permute.xlu1 %846  ;;  %1141 = vmatprep.subr.mxu1 %v1499_v46  ;;  %v755_v48 = vsel %vm753_vm1, %v1553_v9, %v748_v41  ;;  %v756_v55 = vsel %vm753_vm1, %v748_v41, %v1557_v11 }
 0x242   : > { %1142 = vmatpush1.msra.mxu1 %v1465_v33  ;;  %v854_v37 = vsel %vm852_vm14, %v845_v5, %v847_v36  ;;  %v855_v42 = vsel %vm852_vm14, %v847_v36, %v1547_v6 }
 0x243   : > { %1072 = vmatprep.subr.mxu0 %v854_v37 }
 0x244   : > { %1073 = vmatpush1.msra.mxu0 %v853_v38  ;;  %v752_v49 = vpop.permute.xlu0 %751 }
 0x245   : > { %v851_v40 = vpop.permute.xlu1 %850  ;;  %1074 = vmatprep.subr.mxu0 %v821_v32  ;;  %v757_v53 = vsel %vm753_vm1, %v1557_v11, %v752_v49 }
 0x246   : > { %1075 = vmatpush1.msra.mxu0 %v820_v39  ;;  %v856_v33 = vsel %vm852_vm14, %v1547_v6, %v851_v40 }
 0x247   : > { %1143 = vmatprep.subr.mxu1 %v856_v33 }
 0x248   : > { %1144 = vmatpush1.msra.mxu1 %v855_v42 }
 0x249   : > { %v781_v45 = vpop.permute.xlu1 %780  ;;  %1145 = vmatprep.subr.mxu1 %v823_v43 }
 0x24a   : > { %1146 = vmatpush1.msra.mxu1 %v822_v44  ;;  %v788_v46 = vsel %vm786_vm0, %v1551_v8, %v781_v45  ;;  %v789_v52 = vsel %vm786_vm0, %v781_v45, %v1555_v10 }
 0x24b   : > { %1076 = vmatprep.subr.mxu0 %v788_v46 }
 0x24c   : > { %1077 = vmatpush1.msra.mxu0 %v787_v47 }
 0x24d   : > { %v785_v50 = vpop.permute.xlu1 %784  ;;  %1078 = vmatprep.subr.mxu0 %v755_v48 }
 0x24e   : > { %v790_v51 = vsel %vm786_vm0, %v1555_v10, %v785_v50 }
 0x24f   : > { %1147 = vmatprep.subr.mxu1 %v790_v51 }
 0x250   : > { %1148 = vmatpush1.msra.mxu1 %v789_v52 }
 0x251   : > { %v744_v56 = vpop.permute.xlu1 %743  ;;  %1149 = vmatprep.subr.mxu1 %v757_v53  ;;  %v1043_v58 = vpop.permute.xlu0 %1042 }
 0x252   : > { %v754_v57 = vsel %vm753_vm1, %v744_v56, %v1553_v9  ;;  %1150 = vmatpush1.msra.mxu1 %v756_v55 }
 0x253   : > { %1079 = vmatpush1.msra.mxu0 %v754_v57  ;;  %1268 = vmatmul.mubr.msk.f32.vlgmr.msra.gmra.mxu1 %vm569_vm8, %v1002_v54 }
 0x254   : > { %1267 = vmatmul.mubr.msk.f32.vlgmr.msra.gmra.mxu0 %vm569_vm8, %v1002_v54 }
 0x313   : > { %v1185_v59 = vpop.f32.mrf.mxu1 }
 0x314   : > { %v1186_v60 = vadd.f32 %v1185_v59, %v1043_v58  ;;  %v1114_v61 = vpop.f32.mrf.mxu0 }
 0x315   : > { %v1115_v62 = vadd.f32 %v1114_v61, %v1043_v58  ;;  %v1187_v63 = vpop.f32.mrf.mxu1 }
 0x316   : > { %v1192_v5 = vmax.f32 %v1186_v60, 0.0  ;;  %v1188_v2 = vadd.f32 %v1187_v63, %v1043_v58  ;;  %v1116_v6 = vpop.f32.mrf.mxu0 }
 0x317   : > { %v1190_v7 = vmax.f32 %v1115_v62, 0.0  ;;  %v1117_v8 = vadd.f32 %v1116_v6, %v1043_v58 }
 0x318   : > { %1196 = vst [vmem:[%s224_s25 + $0x10] sm:$0xff] %v1192_v5  ;;  %v1193_v9 = vmax.f32 %v1188_v2, 0.0 }
 0x319   : > { %1194 = vst [vmem:[%s224_s25] sm:$0xff] %v1190_v7  ;;  %v1191_v10 = vmax.f32 %v1117_v8, 0.0 }
 0x31a   : > { %1197 = vst [vmem:[%s224_s25 + $0x18] sm:$0xff] %v1193_v9 }
 0x31b   : > { %1195 = vst [vmem:[%s224_s25 + $0x8] sm:$0xff] %v1191_v10 }
 0x31c PF: > { %s15_s18 = sadd.s32 1, %s1303_s18  }
 0x31d   : > { %p12_p4 = scmp.ge.s32.totalorder %s15_s18, 4  }
 0x31f   :  { %14 = sbr.rel (!%p12_p4) target bundleno = 1 (0x1), region = 70 }

</bundles_post_ra>
